<compile_context>
chip_gen: v5e
topology: v5e:2x2
jax: 0.10.0
libtpu: 0.0.40
codegen_flags: <defaults>
</compile_context>

<pallas_src>
import jax
import jax.numpy as jnp
from jax.experimental import pallas as pl
from jax.experimental.pallas import tpu as pltpu

HIDDEN = 32
LANES = 128                       # vreg lane width
VMEM_BUDGET = 32 * 1024 * 1024    # accounted double-buffered footprint target
VMEM_LIMIT = 48 * 1024 * 1024     # scoped-VMEM limit passed to Mosaic (OK on v5e..v7x)


def _round_up(v, m):
    return ((v + m - 1) // m) * m


def mlp_kernel(x_ref, w1_ref, b1_ref, w2_ref, b2_ref, w3_ref, b3_ref, o_ref):
    # One (tile_n, in_size) row-tile of x per grid step; weights/biases are the same
    # resident block every step.  The entire 3-layer MLP runs on the tile; all matmuls
    # accumulate in f32 on the MXU.
    x = x_ref[...]
    h1 = jnp.dot(x, w1_ref[...], preferred_element_type=jnp.float32) + b1_ref[...]
    h1 = jnp.maximum(h1, 0.0)
    h2 = jnp.dot(h1.astype(w2_ref.dtype), w2_ref[...],
                 preferred_element_type=jnp.float32) + b2_ref[...]
    h2 = jnp.maximum(h2, 0.0)
    y = jnp.dot(h2.astype(w3_ref.dtype), w3_ref[...],
                preferred_element_type=jnp.float32) + b3_ref[...]
    o_ref[...] = y.astype(o_ref.dtype)


def neuralnet_forward(x, params, *, tile_n=8192, use_bf16_inputs=False):
    """x: (N, in_size); params: dict of (w1,b1,w2,b2,w3,b3).

    Weights are stored transposed relative to torch (shape (in, out)) so the kernel
    computes y = x @ W + b directly on the MXU.  Returns (N, out_size) float32.
    """
    w1, b1, w2, b2, w3, b3 = (
        params["w1"], params["b1"], params["w2"],
        params["b2"], params["w3"], params["b3"],
    )
    n, in_size = x.shape
    out_size = w3.shape[1]

    if use_bf16_inputs:
        # Halves the dominant HBM read; accumulation stays f32 (no bit-exact parity).
        x = x.astype(jnp.bfloat16)
        w1 = w1.astype(jnp.bfloat16)
        w2 = w2.astype(jnp.bfloat16)
        w3 = w3.astype(jnp.bfloat16)

    # --- Output width: only lane-pad when out_size is large and misaligned. ---
    if out_size >= 64 and out_size % LANES != 0:
        out_block = _round_up(out_size, LANES)
    else:
        out_block = out_size
    if out_block != out_size:
        w3 = jnp.zeros((HIDDEN, out_block), w3.dtype).at[:, :out_size].set(w3)
        b3 = jnp.zeros((1, out_block), jnp.float32).at[:, :out_size].set(b3)

    # --- Batch tiling ---------------------------------------------------------
    # Double-buffered VMEM footprint (lane-padded) of the two streamed operands
    # plus the resident (also double-buffered) weights/biases.
    resident_arrays = (w1, b1, w2, b2, w3, b3)

    def tile_fp(shape, itemsize):
        r, c = shape
        return _round_up(r, 8) * _round_up(c, LANES) * itemsize

    weights_bytes = 2 * sum(tile_fp(a.shape, a.dtype.itemsize) for a in resident_arrays)
    per_row = 2 * (_round_up(in_size, LANES) * x.dtype.itemsize
                   + _round_up(out_block, LANES) * 4)
    max_tile = max(8, (VMEM_BUDGET - weights_bytes) // per_row)

    tile_n = min(tile_n, max_tile)
    tile_n = min(tile_n, _round_up(max(n, 8), 8))          # no bigger than padded batch
    tile_n = min(tile_n, _round_up(pl.cdiv(n, 2), 8))      # >=2 grid steps (v7x 2-TC split)
    tile_n = max(8, (tile_n // 8) * 8)

    n_pad = pl.cdiv(n, tile_n) * tile_n
    if n_pad != n:
        x = jnp.pad(x, ((0, n_pad - n), (0, 0)))
    grid = (n_pad // tile_n,)

    def resident(arr):
        # Full-array block, same index every grid step -> stays in VMEM.
        return pl.BlockSpec(arr.shape, lambda i: (0, 0))

    y_pad = pl.pallas_call(
        mlp_kernel,
        out_shape=jax.ShapeDtypeStruct((n_pad, out_block), jnp.float32),
        grid=grid,
        in_specs=[
            pl.BlockSpec((tile_n, in_size), lambda i: (i, 0)),  # streamed x tile
            resident(w1), resident(b1),
            resident(w2), resident(b2),
            resident(w3), resident(b3),
        ],
        out_specs=pl.BlockSpec((tile_n, out_block), lambda i: (i, 0)),
        compiler_params=pltpu.CompilerParams(
            dimension_semantics=("parallel",),
            vmem_limit_bytes=VMEM_LIMIT,
        ),
    )(x, w1, b1, w2, b2, w3, b3)

    if n_pad != n or out_block != out_size:
        y_pad = y_pad[:n, :out_size]
    return y_pad


def init_params(key, in_size, out_size):
    """Deterministic init mimicking torch.nn.Linear (uniform +/- 1/sqrt(fan_in))."""
    ks = jax.random.split(key, 6)

    def lin(kw, kb, fan_in, fan_out):
        bound = 1.0 / jnp.sqrt(fan_in)
        w = jax.random.uniform(kw, (fan_in, fan_out), jnp.float32, -bound, bound)
        b = jax.random.uniform(kb, (1, fan_out), jnp.float32, -bound, bound)
        return w, b

    w1, b1 = lin(ks[0], ks[1], in_size, HIDDEN)
    w2, b2 = lin(ks[2], ks[3], HIDDEN, HIDDEN)
    w3, b3 = lin(ks[4], ks[5], HIDDEN, out_size)
    return {"w1": w1, "b1": b1, "w2": w2, "b2": b2, "w3": w3, "b3": b3}


def reference_forward(x, p):
    h1 = jnp.maximum(x @ p["w1"] + p["b1"], 0.0)
    h2 = jnp.maximum(h1 @ p["w2"] + p["b2"], 0.0)
    return h2 @ p["w3"] + p["b3"]


# TODO(synk): NeuralNet.step (loss_fn, SGD update) is training logic with no
# single-kernel Pallas equivalent here; only the forward pass is implemented.

if __name__ == "__main__":
    # Small deterministic test; N deliberately not a multiple of the tile so the
    # pad/grid/slice path is exercised (>=2 grid steps via the v7x cap).
    N, IN_SIZE, OUT_SIZE = 200, 16, 4

    key = jax.random.PRNGKey(0)
    k_x, k_p = jax.random.split(key)
    x = jax.random.normal(k_x, (N, IN_SIZE), dtype=jnp.float32)
    params = init_params(k_p, IN_SIZE, OUT_SIZE)
    y_ref = reference_forward(x, params)

    # Default (auto) tile selection, f32 path: must match torch-equivalent reference.
    y = jax.block_until_ready(neuralnet_forward(x, params))
    assert y.shape == (N, OUT_SIZE)
    assert jnp.allclose(y, y_ref, atol=1e-5, rtol=1e-5)

    # Explicit small tile: exercises a longer grid (multiple batch tiles + padding).
    y_small = jax.block_until_ready(neuralnet_forward(x, params, tile_n=32))
    assert jnp.allclose(y_small, y_ref, atol=1e-5, rtol=1e-5)

    # Optional bf16-input path (bandwidth optimization): looser tolerance.
    y_bf16 = jax.block_until_ready(
        neuralnet_forward(x, params, use_bf16_inputs=True))
    assert jnp.allclose(y_bf16, y_ref, atol=1e-1, rtol=1e-1)

    print("KERNEL_OK")
</pallas_src>

<mosaic_0001>
module attributes {stable_mosaic.version = 11 : i64} {
  func.func @mlp_kernel(%arg0: i32, %arg1: memref<104x16xf32, #tpu.memory_space<vmem>>, %arg2: memref<16x32xf32, #tpu.memory_space<vmem>>, %arg3: memref<1x32xf32, #tpu.memory_space<vmem>>, %arg4: memref<32x32xf32, #tpu.memory_space<vmem>>, %arg5: memref<1x32xf32, #tpu.memory_space<vmem>>, %arg6: memref<32x4xf32, #tpu.memory_space<vmem>>, %arg7: memref<1x4xf32, #tpu.memory_space<vmem>>, %arg8: memref<104x4xf32, #tpu.memory_space<vmem>>) attributes {dimension_semantics = [#tpu.dimension_semantics<parallel>], iteration_bounds = array<i64: 2>, scalar_prefetch = 0 : i64, scratch_operands = 0 : i64, tpu.core_type = #tpu.core_type<tc>, window_params = [{transform_indices = @transform_0, window_bounds = array<i64: 104, 16>}, {pipeline_mode = #tpu.pipeline_mode<synchronous>, transform_indices = @transform_1, window_bounds = array<i64: 16, 32>}, {pipeline_mode = #tpu.pipeline_mode<synchronous>, transform_indices = @transform_2, window_bounds = array<i64: 1, 32>}, {pipeline_mode = #tpu.pipeline_mode<synchronous>, transform_indices = @transform_3, window_bounds = array<i64: 32, 32>}, {pipeline_mode = #tpu.pipeline_mode<synchronous>, transform_indices = @transform_4, window_bounds = array<i64: 1, 32>}, {pipeline_mode = #tpu.pipeline_mode<synchronous>, transform_indices = @transform_5, window_bounds = array<i64: 32, 4>}, {pipeline_mode = #tpu.pipeline_mode<synchronous>, transform_indices = @transform_6, window_bounds = array<i64: 1, 4>}, {transform_indices = @transform_7, window_bounds = array<i64: 104, 4>}]} {
    %c0 = arith.constant 0 : index
    %c0_0 = arith.constant 0 : index
    %0 = vector.load %arg1[%c0, %c0_0] : memref<104x16xf32, #tpu.memory_space<vmem>>, vector<104x16xf32>
    %c0_1 = arith.constant 0 : index
    %c0_2 = arith.constant 0 : index
    %1 = vector.load %arg2[%c0_1, %c0_2] : memref<16x32xf32, #tpu.memory_space<vmem>>, vector<16x32xf32>
    %cst = arith.constant dense<0.000000e+00> : vector<104x32xf32>
    %2 = tpu.matmul %0, %1, %cst {dimension_numbers = #tpu.dot_dimension_numbers<[1], [0], [0], [1], [0, 0, 1, 1], [], []>} : vector<104x16xf32>, vector<16x32xf32>, vector<104x32xf32> -> vector<104x32xf32>
    %c0_3 = arith.constant 0 : index
    %c0_4 = arith.constant 0 : index
    %3 = vector.load %arg3[%c0_3, %c0_4] : memref<1x32xf32, #tpu.memory_space<vmem>>, vector<1x32xf32>
    %4 = vector.broadcast %3 : vector<1x32xf32> to vector<104x32xf32>
    %5 = arith.addf %2, %4 : vector<104x32xf32>
    %cst_5 = arith.constant 0.000000e+00 : f32
    %6 = vector.broadcast %cst_5 : f32 to vector<104x32xf32>
    %7 = arith.maximumf %5, %6 : vector<104x32xf32>
    %c0_6 = arith.constant 0 : index
    %c0_7 = arith.constant 0 : index
    %8 = vector.load %arg4[%c0_6, %c0_7] : memref<32x32xf32, #tpu.memory_space<vmem>>, vector<32x32xf32>
    %cst_8 = arith.constant dense<0.000000e+00> : vector<104x32xf32>
    %9 = tpu.matmul %7, %8, %cst_8 {dimension_numbers = #tpu.dot_dimension_numbers<[1], [0], [0], [1], [0, 0, 1, 1], [], []>} : vector<104x32xf32>, vector<32x32xf32>, vector<104x32xf32> -> vector<104x32xf32>
    %c0_9 = arith.constant 0 : index
    %c0_10 = arith.constant 0 : index
    %10 = vector.load %arg5[%c0_9, %c0_10] : memref<1x32xf32, #tpu.memory_space<vmem>>, vector<1x32xf32>
    %11 = vector.broadcast %10 : vector<1x32xf32> to vector<104x32xf32>
    %12 = arith.addf %9, %11 : vector<104x32xf32>
    %cst_11 = arith.constant 0.000000e+00 : f32
    %13 = vector.broadcast %cst_11 : f32 to vector<104x32xf32>
    %14 = arith.maximumf %12, %13 : vector<104x32xf32>
    %c0_12 = arith.constant 0 : index
    %c0_13 = arith.constant 0 : index
    %15 = vector.load %arg6[%c0_12, %c0_13] : memref<32x4xf32, #tpu.memory_space<vmem>>, vector<32x4xf32>
    %cst_14 = arith.constant dense<0.000000e+00> : vector<104x4xf32>
    %16 = tpu.matmul %14, %15, %cst_14 {dimension_numbers = #tpu.dot_dimension_numbers<[1], [0], [0], [1], [0, 0, 1, 1], [], []>} : vector<104x32xf32>, vector<32x4xf32>, vector<104x4xf32> -> vector<104x4xf32>
    %c0_15 = arith.constant 0 : index
    %c0_16 = arith.constant 0 : index
    %17 = vector.load %arg7[%c0_15, %c0_16] : memref<1x4xf32, #tpu.memory_space<vmem>>, vector<1x4xf32>
    %18 = vector.broadcast %17 : vector<1x4xf32> to vector<104x4xf32>
    %19 = arith.addf %16, %18 : vector<104x4xf32>
    %c0_17 = arith.constant 0 : index
    %c0_18 = arith.constant 0 : index
    %20 = vector.load %arg8[%c0_17, %c0_18] : memref<104x4xf32, #tpu.memory_space<vmem>>, vector<104x4xf32>
    tpu.vector_store %arg8[%c0_17, %c0_18], %19 {strides = array<i32>} : memref<104x4xf32, #tpu.memory_space<vmem>>, vector<104x4xf32>,
    return
  }
  func.func @transform_0(%arg0: i32) -> (i32, i32) {
    %c0_i32 = arith.constant 0 : i32
    %c0_i32_0 = arith.constant 0 : i32
    return %arg0, %c0_i32 : i32, i32
  }
  func.func @transform_1(%arg0: i32) -> (i32, i32) {
    %c0_i32 = arith.constant 0 : i32
    %c0_i32_0 = arith.constant 0 : i32
    %c0_i32_1 = arith.constant 0 : i32
    return %c0_i32, %c0_i32_0 : i32, i32
  }
  func.func @transform_2(%arg0: i32) -> (i32, i32) {
    %c0_i32 = arith.constant 0 : i32
    %c0_i32_0 = arith.constant 0 : i32
    %c0_i32_1 = arith.constant 0 : i32
    return %c0_i32, %c0_i32_0 : i32, i32
  }
  func.func @transform_3(%arg0: i32) -> (i32, i32) {
    %c0_i32 = arith.constant 0 : i32
    %c0_i32_0 = arith.constant 0 : i32
    %c0_i32_1 = arith.constant 0 : i32
    return %c0_i32, %c0_i32_0 : i32, i32
  }
  func.func @transform_4(%arg0: i32) -> (i32, i32) {
    %c0_i32 = arith.constant 0 : i32
    %c0_i32_0 = arith.constant 0 : i32
    %c0_i32_1 = arith.constant 0 : i32
    return %c0_i32, %c0_i32_0 : i32, i32
  }
  func.func @transform_5(%arg0: i32) -> (i32, i32) {
    %c0_i32 = arith.constant 0 : i32
    %c0_i32_0 = arith.constant 0 : i32
    %c0_i32_1 = arith.constant 0 : i32
    return %c0_i32, %c0_i32_0 : i32, i32
  }
  func.func @transform_6(%arg0: i32) -> (i32, i32) {
    %c0_i32 = arith.constant 0 : i32
    %c0_i32_0 = arith.constant 0 : i32
    %c0_i32_1 = arith.constant 0 : i32
    return %c0_i32, %c0_i32_0 : i32, i32
  }
  func.func @transform_7(%arg0: i32) -> (i32, i32) {
    %c0_i32 = arith.constant 0 : i32
    %c0_i32_0 = arith.constant 0 : i32
    return %arg0, %c0_i32 : i32, i32
  }
}

</mosaic_0001>

<bundles_post_ra>
// kernel: tpu_custom_call.1
= control target key start
LH: loop header
LB: loop body
LE: loop exit
PB: predicated region body
PF: predicated region fallthrough
CT: control target
= control target key end

     0   :  { %s817_s24 = smov 0   ;;  %s947_s0 = inlined_call_operand.vmem [shape: f32[208,16], index: 0, kind: input, shape index: {}]   ;;  %s948_s1 = inlined_call_operand.vmem [shape: f32[16,32], index: 1, kind: input, shape index: {}]   ;;  %s949_s2 = inlined_call_operand.vmem [shape: f32[1,32], index: 2, kind: input, shape index: {}]   ;;  %s950_s3 = inlined_call_operand.vmem [shape: f32[32,32], index: 3, kind: input, shape index: {}]   ;;  %s951_s4 = inlined_call_operand.vmem [shape: f32[1,32], index: 4, kind: input, shape index: {}]   ;;  %s952_s5 = inlined_call_operand.vmem [shape: f32[32,4], index: 5, kind: input, shape index: {}]   ;;  %s953_s6 = inlined_call_operand.vmem [shape: f32[1,4], index: 6, kind: input, shape index: {}]   ;;  %s954_s7 = inlined_call_operand.vmem [shape: f32[208,4], index: 7, kind: output, shape index: {}]  }
   0x1 LB: > { %s700_s25 = sadd.s32 4294967295, %s775_s24   ;;  %p704_p0 = scmp.ge.s32.totalorder %s775_s24, 1  ;;  %s775_s24 = sphi %s817_s24, %s17_s24  }
   0x2   : > { %p238_p1 = scmp.lt.s32.totalorder %s775_s24, 3 }
   0x4   : > { %p239_p2 = pnand %p704_p0, %p238_p1 }
   0x5   : > { %s270_s30 = smul.u32 (!%p239_p2), 13, %s700_s25 }
   0x6   : > { %242 = sbr.rel (%p239_p2) target bundleno = 482 (0x1e2), region = 48 }
   0x7   : > { %p271_p3 = scmp.lt.s32.totalorder (!%p239_p2), %s270_s30, 25 }
   0xb   : > { %v296_v0 = vld [vmem:[%s948_s1 + $0x8] sm:$0xff]  ;;  %v295_v1 = vld [vmem:[%s948_s1] sm:$0xff]  ;;  %s956_s30 = smov (!%p271_p3, %s270_s30), 25  ;;  %vm301_vm0 = vcmask 130048   ;;  %v413_v11 = vld [vmem:[%s950_s3 + $0x18] sm:$0xff]  ;;  %vm418_vm1 = vcmask 261120  }
   0xc   : > { %355 = vmatpush.msra.mxu0 %v296_v0  ;;  %748 = vmatpush.msra.mxu3 %v296_v0  ;;  %s705_s8 = sshll.u32 %s956_s30, 3  ;;  %v412_v16 = vld [vmem:[%s950_s3 + $0x10] sm:$0xff]  ;;  %v411_v17 = vld [vmem:[%s950_s3 + $0x8] sm:$0xff]  ;;  %v410_v18 = vld [vmem:[%s950_s3] sm:$0xff]  ;;  %vm630_vm2 = vcmask 31744  }
   0xd   : > { %s274_s11 = scalar_lea.vmem %s947_s0, %s705_s8  ;;  %470 = vmatpush.msra.mxu1 %v413_v11  ;;  %v766_v19 = vld [vmem:[%s949_s2] ss:$0 sm:$0xff]  ;;  %v530_v47 = vld [vmem:[%s952_s5 + $0x18] sm:$0xff]  ;;  %v529_v60 = vld [vmem:[%s952_s5 + $0x10] sm:$0xff]  ;;  %s916_s16 = scalar_lea.vmem %s954_s7, %s705_s8 }
   0xe   : > { %356 = vmatpush.msra.mxu0 %v295_v1  ;;  %749 = vmatpush.msra.mxu3 %v295_v1  ;;  %v282_v2 = vld [vmem:[%s274_s11] sm:$0xff]  ;;  %v283_v3 = vld [vmem:[%s274_s11 + $0x8] sm:$0xff]  ;;  %v292_v4 = vld [vmem:[%s274_s11 + $0x50] sm:$0xff] }
   0xf   : > { %707 = vmatmul.msk.f32.vlgmr.msra.gmra.mxu0 %vm301_vm0, %v282_v2  ;;  %717 = vmatmul.msk.f32.vlgmr.msra.gmra.mxu3 %vm301_vm0, %v292_v4  ;;  %v284_v5 = vld [vmem:[%s274_s11 + $0x10] sm:$0xff]  ;;  %v293_v6 = vld [vmem:[%s274_s11 + $0x58] sm:$0xff]  ;;  %v294_v8 = vld [vmem:[%s274_s11 + $0x60] sm:$0xff] }
  0x10   : > { %v285_v7 = vld [vmem:[%s274_s11 + $0x18] sm:$0xff]  ;;  %v286_v9 = vld [vmem:[%s274_s11 + $0x20] sm:$0xff]  ;;  %v287_v10 = vld [vmem:[%s274_s11 + $0x28] sm:$0xff]  ;;  %750 = vmatpush.msrb.mxu3 %v413_v11  ;;  %471 = vmatpush.msra.mxu1 %v412_v16 }
  0x11   : > { %v288_v12 = vld [vmem:[%s274_s11 + $0x30] sm:$0xff]  ;;  %v289_v13 = vld [vmem:[%s274_s11 + $0x38] sm:$0xff]  ;;  %v290_v14 = vld [vmem:[%s274_s11 + $0x40] sm:$0xff]  ;;  %586 = vmatpush.msra.mxu2 %v530_v47 }
  0x12   : > { %v291_v15 = vld [vmem:[%s274_s11 + $0x48] sm:$0xff]  ;;  %751 = vmatpush.msrb.mxu3 %v412_v16  ;;  %472 = vmatpush.msra.mxu1 %v411_v17  ;;  %v527_v62 = vld [vmem:[%s952_s5] sm:$0xff] }
  0x13   : > { %587 = vmatpush.msra.mxu2 %v529_v60  ;;  %v528_v61 = vld [vmem:[%s952_s5 + $0x8] sm:$0xff]  ;;  %v767_v63 = vld [vmem:[%s951_s4] ss:$0 sm:$0xff] }
  0x14   : > { %752 = vmatpush.msrb.mxu3 %v411_v17  ;;  %473 = vmatpush.msra.mxu1 %v410_v18 }
  0x15   : > { %588 = vmatpush.msra.mxu2 %v528_v61 }
  0x16   : > { %753 = vmatpush.msrb.mxu3 %v410_v18 }
  0x17   : > { %708 = vmatmul.msk.f32.gmra.mxu0 %vm301_vm0, %v283_v3  ;;  %718 = vmatmul.msk.f32.gmra.mxu3 %vm301_vm0, %v293_v6 }
  0x18   : > { %754 = vmatpush.msra.mxu3 %v530_v47  ;;  %589 = vmatpush.msra.mxu2 %v527_v62 }
  0x1a   : > { %755 = vmatpush.msra.mxu3 %v529_v60 }
  0x1c   : > { %756 = vmatpush.msra.mxu3 %v528_v61 }
  0x1e   : > { %757 = vmatpush.msra.mxu3 %v527_v62 }
  0x1f   : > { %709 = vmatmul.msk.f32.gmra.mxu0 %vm301_vm0, %v284_v5  ;;  %719 = vmatmul.msk.f32.gmra.mxu3 %vm301_vm0, %v294_v8 }
  0x27   : > { %710 = vmatmul.msk.f32.gmra.mxu0 %vm301_vm0, %v285_v7 }
  0x2f   : > { %711 = vmatmul.msk.f32.gmra.mxu0 %vm301_vm0, %v286_v9 }
  0x37   : > { %712 = vmatmul.msk.f32.gmra.mxu0 %vm301_vm0, %v287_v10 }
  0x3f   : > { %713 = vmatmul.msk.f32.gmra.mxu0 %vm301_vm0, %v288_v12 }
  0x47   : > { %714 = vmatmul.msk.f32.gmra.mxu0 %vm301_vm0, %v289_v13 }
  0x4f   : > { %715 = vmatmul.msk.f32.gmra.mxu0 %vm301_vm0, %v290_v14 }
  0x57   : > { %716 = vmatmul.msk.f32.gmra.mxu0 %vm301_vm0, %v291_v15 }
  0x8c   : > { %v358_v20 = vpop.f32.mrf.mxu0 }
  0x8d   : > { %v359_v21 = vadd.f32 %v766_v19, %v358_v20 }
  0x8f   : > { %v397_v22 = vmax.f32 %v359_v21, 0.0 }
  0x91   : > { %720 = vmatmul.msk.f32.vlgmr.msra.gmra.mxu1 %vm418_vm1, %v397_v22 }
  0x92   : > { %v388_v28 = vpop.f32.mrf.mxu3 }
  0x93   : > { %v389_v30 = vadd.f32 %v766_v19, %v388_v28 }
  0x94   : > { %v361_v23 = vpop.f32.mrf.mxu0 }
  0x95   : > { %v362_v24 = vadd.f32 %v766_v19, %v361_v23  ;;  %v407_v31 = vmax.f32 %v389_v30, 0.0 }
  0x97   : > { %v398_v25 = vmax.f32 %v362_v24, 0.0  ;;  %730 = vmatmul.msk.f32.vlgmr.msrb.gmra.mxu3 %vm418_vm1, %v407_v31 }
  0x99   : > { %721 = vmatmul.msk.f32.gmra.mxu1 %vm418_vm1, %v398_v25 }
  0x9a   : > { %v391_v34 = vpop.f32.mrf.mxu3 }
  0x9b   : > { %v392_v36 = vadd.f32 %v766_v19, %v391_v34 }
  0x9c   : > { %v364_v26 = vpop.f32.mrf.mxu0 }
  0x9d   : > { %v365_v27 = vadd.f32 %v766_v19, %v364_v26  ;;  %v408_v37 = vmax.f32 %v392_v36, 0.0 }
  0x9f   : > { %v399_v29 = vmax.f32 %v365_v27, 0.0  ;;  %731 = vmatmul.msk.f32.gmra.mxu3 %vm418_vm1, %v408_v37 }
  0xa1   : > { %722 = vmatmul.msk.f32.gmra.mxu1 %vm418_vm1, %v399_v29 }
  0xa2   : > { %v394_v40 = vpop.f32.mrf.mxu3 }
  0xa3   : > { %v395_v42 = vadd.f32 %v766_v19, %v394_v40 }
  0xa4   : > { %v367_v32 = vpop.f32.mrf.mxu0 }
  0xa5   : > { %v368_v33 = vadd.f32 %v766_v19, %v367_v32  ;;  %v409_v43 = vmax.f32 %v395_v42, 0.0 }
  0xa7   : > { %v400_v35 = vmax.f32 %v368_v33, 0.0  ;;  %732 = vmatmul.msk.f32.gmra.mxu3 %vm418_vm1, %v409_v43 }
  0xa9   : > { %723 = vmatmul.msk.f32.gmra.mxu1 %vm418_vm1, %v400_v35 }
  0xac   : > { %v370_v38 = vpop.f32.mrf.mxu0 }
  0xad   : > { %v371_v39 = vadd.f32 %v766_v19, %v370_v38 }
  0xaf   : > { %v401_v41 = vmax.f32 %v371_v39, 0.0  ;;  %v768_v39 = vld [vmem:[%s953_s6] ss:$0 sm:$0xff] }
  0xb1   : > { %724 = vmatmul.msk.f32.gmra.mxu1 %vm418_vm1, %v401_v41 }
  0xb4   : > { %v373_v44 = vpop.f32.mrf.mxu0 }
  0xb5   : > { %v374_v45 = vadd.f32 %v766_v19, %v373_v44 }
  0xb7   : > { %v402_v46 = vmax.f32 %v374_v45, 0.0 }
  0xb9   : > { %725 = vmatmul.msk.f32.gmra.mxu1 %vm418_vm1, %v402_v46 }
  0xbc   : > { %v376_v48 = vpop.f32.mrf.mxu0 }
  0xbd   : > { %v377_v49 = vadd.f32 %v766_v19, %v376_v48 }
  0xbf   : > { %v403_v50 = vmax.f32 %v377_v49, 0.0 }
  0xc1   : > { %726 = vmatmul.msk.f32.gmra.mxu1 %vm418_vm1, %v403_v50 }
  0xc4   : > { %v379_v51 = vpop.f32.mrf.mxu0 }
  0xc5   : > { %v380_v52 = vadd.f32 %v766_v19, %v379_v51 }
  0xc7   : > { %v404_v53 = vmax.f32 %v380_v52, 0.0 }
  0xc9   : > { %727 = vmatmul.msk.f32.gmra.mxu1 %vm418_vm1, %v404_v53 }
  0xcc   : > { %v382_v54 = vpop.f32.mrf.mxu0 }
  0xcd   : > { %v383_v55 = vadd.f32 %v766_v19, %v382_v54 }
  0xcf   : > { %v405_v56 = vmax.f32 %v383_v55, 0.0 }
  0xd1   : > { %728 = vmatmul.msk.f32.gmra.mxu1 %vm418_vm1, %v405_v56 }
  0xd4   : > { %v385_v57 = vpop.f32.mrf.mxu0 }
  0xd5   : > { %v386_v58 = vadd.f32 %v766_v19, %v385_v57 }
  0xd7   : > { %v406_v59 = vmax.f32 %v386_v58, 0.0 }
  0xd9   : > { %729 = vmatmul.msk.f32.gmra.mxu1 %vm418_vm1, %v406_v59 }
 0x10e   : > { %v475_v0 = vpop.f32.mrf.mxu1 }
 0x10f   : > { %v476_v1 = vadd.f32 %v767_v63, %v475_v0 }
 0x111   : > { %v514_v2 = vmax.f32 %v476_v1, 0.0 }
 0x113   : > { %733 = vmatmul.msk.f32.vlgmr.msra.gmra.mxu2 %vm418_vm1, %v514_v2 }
 0x116   : > { %v478_v3 = vpop.f32.mrf.mxu1 }
 0x117   : > { %v479_v4 = vadd.f32 %v767_v63, %v478_v3 }
 0x119   : > { %v515_v5 = vmax.f32 %v479_v4, 0.0 }
 0x11a   : > { %v505_v10 = vpop.f32.mrf.mxu3 }
 0x11b   : > { %734 = vmatmul.msk.f32.gmra.mxu2 %vm418_vm1, %v515_v5  ;;  %v506_v12 = vadd.f32 %v767_v63, %v505_v10 }
 0x11d   : > { %v524_v14 = vmax.f32 %v506_v12, 0.0 }
 0x11e   : > { %v481_v6 = vpop.f32.mrf.mxu1 }
 0x11f   : > { %v482_v7 = vadd.f32 %v767_v63, %v481_v6  ;;  %743 = vmatmul.msk.f32.vlgmr.msra.gmra.mxu3 %vm418_vm1, %v524_v14 }
 0x121   : > { %v516_v8 = vmax.f32 %v482_v7, 0.0 }
 0x122   : > { %v508_v16 = vpop.f32.mrf.mxu3 }
 0x123   : > { %735 = vmatmul.msk.f32.gmra.mxu2 %vm418_vm1, %v516_v8  ;;  %v509_v18 = vadd.f32 %v767_v63, %v508_v16 }
 0x125   : > { %v525_v20 = vmax.f32 %v509_v18, 0.0 }
 0x126   : > { %v484_v9 = vpop.f32.mrf.mxu1 }
 0x127   : > { %v485_v11 = vadd.f32 %v767_v63, %v484_v9  ;;  %744 = vmatmul.msk.f32.gmra.mxu3 %vm418_vm1, %v525_v20 }
 0x129   : > { %v517_v13 = vmax.f32 %v485_v11, 0.0 }
 0x12a   : > { %v511_v22 = vpop.f32.mrf.mxu3 }
 0x12b   : > { %736 = vmatmul.msk.f32.gmra.mxu2 %vm418_vm1, %v517_v13  ;;  %v512_v24 = vadd.f32 %v767_v63, %v511_v22 }
 0x12d   : > { %v526_v26 = vmax.f32 %v512_v24, 0.0 }
 0x12e   : > { %v487_v15 = vpop.f32.mrf.mxu1 }
 0x12f   : > { %v488_v17 = vadd.f32 %v767_v63, %v487_v15  ;;  %745 = vmatmul.msk.f32.gmra.mxu3 %vm418_vm1, %v526_v26 }
 0x131   : > { %v518_v19 = vmax.f32 %v488_v17, 0.0 }
 0x133   : > { %737 = vmatmul.msk.f32.gmra.mxu2 %vm418_vm1, %v518_v19 }
 0x136   : > { %v490_v21 = vpop.f32.mrf.mxu1 }
 0x137   : > { %v491_v23 = vadd.f32 %v767_v63, %v490_v21 }
 0x139   : > { %v519_v25 = vmax.f32 %v491_v23, 0.0 }
 0x13b   : > { %738 = vmatmul.msk.f32.gmra.mxu2 %vm418_vm1, %v519_v25 }
 0x13e   : > { %v493_v27 = vpop.f32.mrf.mxu1 }
 0x13f   : > { %v494_v28 = vadd.f32 %v767_v63, %v493_v27 }
 0x141   : > { %v520_v29 = vmax.f32 %v494_v28, 0.0 }
 0x143   : > { %739 = vmatmul.msk.f32.gmra.mxu2 %vm418_vm1, %v520_v29 }
 0x146   : > { %v496_v30 = vpop.f32.mrf.mxu1 }
 0x147   : > { %v497_v31 = vadd.f32 %v767_v63, %v496_v30 }
 0x149   : > { %v521_v32 = vmax.f32 %v497_v31, 0.0 }
 0x14b   : > { %740 = vmatmul.msk.f32.gmra.mxu2 %vm418_vm1, %v521_v32 }
 0x14e   : > { %v499_v33 = vpop.f32.mrf.mxu1 }
 0x14f   : > { %v500_v34 = vadd.f32 %v767_v63, %v499_v33 }
 0x151   : > { %v522_v35 = vmax.f32 %v500_v34, 0.0 }
 0x153   : > { %741 = vmatmul.msk.f32.gmra.mxu2 %vm418_vm1, %v522_v35 }
 0x156   : > { %v502_v36 = vpop.f32.mrf.mxu1 }
 0x157   : > { %v503_v37 = vadd.f32 %v767_v63, %v502_v36 }
 0x159   : > { %v523_v38 = vmax.f32 %v503_v37, 0.0 }
 0x15b   : > { %742 = vmatmul.msk.f32.gmra.mxu2 %vm418_vm1, %v523_v38 }
 0x196   : > { %v591_v40 = vpop.f32.mrf.mxu2 }
 0x197   : > { %v592_v41 = vadd.f32 %v768_v39, %v591_v40 }
 0x199   : > { %631 = vst.msk [vmem:[%s916_s16] sm:$0xff] %vm630_vm2, %v592_v41 }
 0x19e   : > { %v594_v42 = vpop.f32.mrf.mxu2 }
 0x19f   : > { %v595_v43 = vadd.f32 %v768_v39, %v594_v42 }
 0x1a1   : > { %632 = vst.msk [vmem:[%s916_s16 + $0x8] sm:$0xff] %vm630_vm2, %v595_v43 }
 0x1a2   : > { %v621_v47 = vpop.f32.mrf.mxu3 }
 0x1a3   : > { %v622_v49 = vadd.f32 %v768_v39, %v621_v47 }
 0x1a5   : > { %641 = vst.msk [vmem:[%s916_s16 + $0x50] sm:$0xff] %vm630_vm2, %v622_v49 }
 0x1a6   : > { %v597_v44 = vpop.f32.mrf.mxu2 }
 0x1a7   : > { %v598_v45 = vadd.f32 %v768_v39, %v597_v44 }
 0x1a9   : > { %633 = vst.msk [vmem:[%s916_s16 + $0x10] sm:$0xff] %vm630_vm2, %v598_v45 }
 0x1aa   : > { %v624_v51 = vpop.f32.mrf.mxu3 }
 0x1ab   : > { %v625_v53 = vadd.f32 %v768_v39, %v624_v51 }
 0x1ad   : > { %642 = vst.msk [vmem:[%s916_s16 + $0x58] sm:$0xff] %vm630_vm2, %v625_v53 }
 0x1ae   : > { %v600_v46 = vpop.f32.mrf.mxu2 }
 0x1af   : > { %v601_v48 = vadd.f32 %v768_v39, %v600_v46 }
 0x1b1   : > { %634 = vst.msk [vmem:[%s916_s16 + $0x18] sm:$0xff] %vm630_vm2, %v601_v48 }
 0x1b2   : > { %v627_v55 = vpop.f32.mrf.mxu3 }
 0x1b3   : > { %v628_v57 = vadd.f32 %v768_v39, %v627_v55 }
 0x1b5   : > { %643 = vst.msk [vmem:[%s916_s16 + $0x60] sm:$0xff] %vm630_vm2, %v628_v57 }
 0x1b6   : > { %v603_v50 = vpop.f32.mrf.mxu2 }
 0x1b7   : > { %v604_v52 = vadd.f32 %v768_v39, %v603_v50 }
 0x1b9   : > { %635 = vst.msk [vmem:[%s916_s16 + $0x20] sm:$0xff] %vm630_vm2, %v604_v52 }
 0x1be   : > { %v606_v54 = vpop.f32.mrf.mxu2 }
 0x1bf   : > { %v607_v56 = vadd.f32 %v768_v39, %v606_v54 }
 0x1c1   : > { %636 = vst.msk [vmem:[%s916_s16 + $0x28] sm:$0xff] %vm630_vm2, %v607_v56 }
 0x1c6   : > { %v609_v58 = vpop.f32.mrf.mxu2 }
 0x1c7   : > { %v610_v59 = vadd.f32 %v768_v39, %v609_v58 }
 0x1c9   : > { %637 = vst.msk [vmem:[%s916_s16 + $0x30] sm:$0xff] %vm630_vm2, %v610_v59 }
 0x1ce   : > { %v612_v60 = vpop.f32.mrf.mxu2 }
 0x1cf   : > { %v613_v61 = vadd.f32 %v768_v39, %v612_v60 }
 0x1d1   : > { %638 = vst.msk [vmem:[%s916_s16 + $0x38] sm:$0xff] %vm630_vm2, %v613_v61 }
 0x1d6   : > { %v615_v62 = vpop.f32.mrf.mxu2 }
 0x1d7   : > { %v616_v63 = vadd.f32 %v768_v39, %v615_v62 }
 0x1d9   : > { %639 = vst.msk [vmem:[%s916_s16 + $0x40] sm:$0xff] %vm630_vm2, %v616_v63 }
 0x1de   : > { %v618_v0 = vpop.f32.mrf.mxu2 }
 0x1df   : > { %v619_v1 = vadd.f32 %v768_v39, %v618_v0 }
 0x1e1   : > { %640 = vst.msk [vmem:[%s916_s16 + $0x48] sm:$0xff] %vm630_vm2, %v619_v1 }
 0x1e2 PF: > { %s17_s24 = sadd.s32 1, %s775_s24  }
 0x1e3   : > { %p14_p4 = scmp.ge.s32.totalorder %s17_s24, 4  }
 0x1e5   :  { %16 = sbr.rel (!%p14_p4) target bundleno = 1 (0x1), region = 78 }

</bundles_post_ra>
